<compile_context>
chip_gen: v6e
topology: v6e:2x2x1
jax: 0.10.0
libtpu: 0.0.40
codegen_flags: <defaults>
</compile_context>

<pallas_src>
import jax
import jax.numpy as jnp
from jax.experimental import pallas as pl
from jax.experimental.pallas import tpu as pltpu


def _round_up(n, m):
    return ((n + m - 1) // m) * m


def _tpu_vmem_capacity_bytes():
    """Best-effort VMEM capacity query; conservative fallback (v7x = 64 MiB)."""
    try:
        return int(pltpu.get_tpu_info().vmem_capacity_bytes)
    except Exception:
        pass
    try:
        kind = jax.devices()[0].device_kind.lower()
        if "7" in kind:          # v7x: 64 MiB per TensorCore
            return 64 << 20
        return 128 << 20         # v5e / v6e
    except Exception:
        return 64 << 20


def _pick_tile_rows(rows, pd_pad, vmem_cap):
    """Biggest row tile that keeps the double-buffered bf16 patch stream well
    inside the scoped-VMEM budget (weights + accumulators get the rest)."""
    budget = min(int(vmem_cap * 3 // 4), 96 << 20)
    per_buf = max(1, budget // 6)                      # 2 bufs <= 1/3 of budget
    cap = max(512, (per_buf // (pd_pad * 2)) // 8 * 8)
    max_tile = 1024 if vmem_cap <= (64 << 20) else 2048  # v7x vs v5e/v6e
    tile = min(max_tile, cap)
    if rows <= tile:
        return _round_up(rows, 8)
    return tile


# ----------------------------------------------------------------------------
# Fused kernel: MAE stub + instance/cluster projector heads for one view.
# ----------------------------------------------------------------------------
def _make_fused_kernel(*, tile_rows, real_rows, patches_per_img, batch,
                       f_pad, loss_scale, mask_needed):
    inv_p = 1.0 / float(patches_per_img)

    def kernel(patches_ref, we_ref, be_ref, wd_ref, bd_ref,
               w13_ref, b13_ref, wzc_ref, bzc_ref,
               zc_ref, loss_ref, present_acc):
        t = pl.program_id(1)
        n_t = pl.num_programs(1)

        @pl.when(t == 0)
        def _init():
            present_acc[...] = jnp.zeros_like(present_acc)
            loss_ref[...] = jnp.zeros_like(loss_ref)

        patches = patches_ref[0]                                # (tile, pd_pad) bf16

        # encoder: patch embed (bf16 MXU, f32 accumulate) -> ReLU (f32)
        enc = jnp.dot(patches, we_ref[...],
                      preferred_element_type=jnp.float32) + be_ref[...]
        enc = jnp.maximum(enc, 0.0)                             # (tile, d_pad) f32

        # mean-pooled "present": pooling matrix built in-kernel from iotas
        # (row r of the flattened patch stream belongs to image r // P);
        # padded rows fall outside every [b*P, (b+1)*P) window -> weight 0.
        col = (jax.lax.broadcasted_iota(jnp.int32, (batch, tile_rows), 1)
               + t * tile_rows)
        img = jax.lax.broadcasted_iota(jnp.int32, (batch, tile_rows), 0)
        lo = img * patches_per_img
        sel = jnp.logical_and(col >= lo, col < lo + patches_per_img)
        pool = sel.astype(jnp.float32) * inv_p                  # (B, tile) f32
        present_acc[...] += jnp.dot(pool, enc,
                                    preferred_element_type=jnp.float32)

        # decoder (bf16 MXU, f32 accumulate) + masked squared error,
        # accumulated per-lane into the resident lane-dense loss block.
        rec = jnp.dot(enc.astype(patches.dtype), wd_ref[...],
                      preferred_element_type=jnp.float32) + bd_ref[...]
        diff = rec - patches.astype(jnp.float32)
        if mask_needed:
            row_id = (t * tile_rows
                      + jax.lax.broadcasted_iota(jnp.int32, (tile_rows, 1), 0))
            diff = diff * (row_id < real_rows).astype(jnp.float32)
        loss_ref[...] += (loss_scale
                          * jnp.sum(diff * diff, axis=0, keepdims=True))[None]

        # projector heads once per view, on the last row-tile (tiny f32 GEMMs).
        @pl.when(t == n_t - 1)
        def _finalize():
            pres = present_acc[...]                             # (B, d_pad) f32
            # fused first layer:  present @ [w1 | w3]
            h = jnp.dot(pres, w13_ref[...],
                        preferred_element_type=jnp.float32) + b13_ref[...]
            h = jnp.maximum(h, 0.0)                             # (B, 2*d_pad)
            # fused block-diagonal second layer: [h1 | h2] @ [[w2,0],[0,w4]]
            zc = jnp.dot(h, wzc_ref[...],
                         preferred_element_type=jnp.float32) + bzc_ref[...]
            z = zc[:, :f_pad]                                   # padded cols are 0
            logits = zc[:, f_pad:]                              # padded cols -1e30

            # L2 normalize (torch F.normalize, eps=1e-12)
            inv_n = jax.lax.rsqrt(
                jnp.maximum(jnp.sum(z * z, axis=1, keepdims=True), 1e-24))
            zc_ref[:, :, :f_pad] = (z * inv_n)[None]

            # softmax over classes (padded logits underflow to 0)
            m = jnp.max(logits, axis=1, keepdims=True)
            e = jnp.exp(logits - m)
            c = e * pl.reciprocal(jnp.sum(e, axis=1, keepdims=True), approx=False)
            zc_ref[:, :, f_pad:] = c[None]

    return kernel


# ----------------------------------------------------------------------------
# Wrapper glue
# ----------------------------------------------------------------------------
def patchify(x, patch):
    # x: (B, C, H, W)  NCHW  ->  (B, P, C*patch*patch)
    B, C, H, W = x.shape
    x = x.reshape(B, C, H // patch, patch, W // patch, patch)
    x = jnp.transpose(x, (0, 2, 4, 1, 3, 5))
    return x.reshape(B, (H // patch) * (W // patch), C * patch * patch)


def network_mae_forward(x_i, x_j, packed, cfg, patch):
    patch_dim, encoder_dim, feature_dim, class_num = cfg
    pd_pad = _round_up(patch_dim, 128)
    d_pad = _round_up(encoder_dim, 128)
    f_pad = _round_up(feature_dim, 128)
    c_pad = _round_up(class_num, 128)
    zc_pad = f_pad + c_pad

    B = x_i.shape[0]
    p_i = patchify(x_i, patch)
    p_j = patchify(x_j, patch)
    P = p_i.shape[1]
    rows = B * P

    vmem_cap = _tpu_vmem_capacity_bytes()
    vmem_limit = min(int(vmem_cap * 3 // 4), 96 << 20)
    tile_rows = _pick_tile_rows(rows, pd_pad, vmem_cap)
    rv = _round_up(rows, tile_rows)
    n_tiles = rv // tile_rows

    def prep(p):
        flat = p.reshape(rows, patch_dim)
        flat = jnp.pad(flat, ((0, rv - rows), (0, pd_pad - patch_dim)))
        return flat.astype(jnp.bfloat16)

    # bf16 staging tensor (half the HBM traffic of the old f32 stack).
    patches = jnp.stack([prep(p_i), prep(p_j)], axis=0)        # (2, rv, pd_pad)

    kernel = _make_fused_kernel(tile_rows=tile_rows, real_rows=rows,
                                patches_per_img=P, batch=B, f_pad=f_pad,
                                loss_scale=1.0 / float(rows * patch_dim),
                                mask_needed=(rv != rows))

    # Advisory cost estimate so XLA schedules the patchify/pad producers
    # around (not serialized with) the custom call.
    gemm_flops_per_tile = (2 * tile_rows * pd_pad * d_pad      # encoder
                           + 2 * tile_rows * d_pad * pd_pad    # decoder
                           + 2 * B * tile_rows * d_pad)        # pooling
    head_flops = 2 * B * d_pad * (2 * d_pad) + 2 * B * (2 * d_pad) * zc_pad
    weight_bytes = sum(int(v.size) * v.dtype.itemsize for v in packed.values())
    cost = pl.CostEstimate(
        flops=int(2 * (n_tiles * gemm_flops_per_tile + head_flops)),
        transcendentals=int(2 * B * (c_pad + 2)),
        bytes_accessed=int(patches.size * patches.dtype.itemsize + weight_bytes
                           + 2 * B * zc_pad * 4 + 2 * pd_pad * 4),
    )

    vmem = pltpu.MemorySpace.VMEM
    zc, loss_lanes = pl.pallas_call(
        kernel,
        out_shape=(jax.ShapeDtypeStruct((2, B, zc_pad), jnp.float32),
                   jax.ShapeDtypeStruct((2, 1, pd_pad), jnp.float32)),
        grid_spec=pltpu.PrefetchScalarGridSpec(
            num_scalar_prefetch=0,
            grid=(2, n_tiles),                       # (views, row tiles)
            in_specs=[
                pl.BlockSpec((1, tile_rows, pd_pad), lambda v, t: (v, t, 0)),
                pl.BlockSpec(memory_space=vmem),     # we  (bf16)
                pl.BlockSpec(memory_space=vmem),     # be  (f32)
                pl.BlockSpec(memory_space=vmem),     # wd  (bf16)
                pl.BlockSpec(memory_space=vmem),     # bd  (f32)
                pl.BlockSpec(memory_space=vmem),     # w13 = [w1 | w3]   (f32)
                pl.BlockSpec(memory_space=vmem),     # b13               (f32)
                pl.BlockSpec(memory_space=vmem),     # wzc = [[w2,0],[0,w4]]
                pl.BlockSpec(memory_space=vmem),     # bzc
            ],
            out_specs=(
                pl.BlockSpec((1, B, zc_pad), lambda v, t: (v, 0, 0)),
                pl.BlockSpec((1, 1, pd_pad), lambda v, t: (v, 0, 0)),
            ),
            scratch_shapes=[pltpu.VMEM((B, d_pad), jnp.float32)],   # present acc
        ),
        compiler_params=pltpu.CompilerParams(
            dimension_semantics=("parallel", "arbitrary"),
            vmem_limit_bytes=vmem_limit),
        cost_estimate=cost,
    )(patches,
      packed["we"], packed["be"], packed["wd"], packed["bd"],
      packed["w13"], packed["b13"], packed["wzc"], packed["bzc"])

    z_i = zc[0, :, :feature_dim]
    z_j = zc[1, :, :feature_dim]
    c_i = zc[0, :, f_pad:f_pad + class_num]
    c_j = zc[1, :, f_pad:f_pad + class_num]
    loss_1 = jnp.sum(loss_lanes[0])
    loss_2 = jnp.sum(loss_lanes[1])
    return (z_i, z_j, c_i, c_j), loss_1, loss_2


# ----------------------------------------------------------------------------
# Parameters (PyTorch Linear stores (out,in); we store (in,out)) + packing
# ----------------------------------------------------------------------------
def init_params(key, patch_dim, encoder_dim, feature_dim, class_num):
    ks = jax.random.split(key, 12)

    def lin(kw, kb, fan_in, fan_out):
        bound = 1.0 / float(fan_in) ** 0.5
        w = jax.random.uniform(kw, (fan_in, fan_out), jnp.float32, -bound, bound)
        b = jax.random.uniform(kb, (1, fan_out), jnp.float32, -bound, bound)
        return w, b

    we, be = lin(ks[0], ks[1], patch_dim, encoder_dim)       # mae stub encoder
    wd, bd = lin(ks[2], ks[3], encoder_dim, patch_dim)       # mae stub decoder
    w1, b1 = lin(ks[4], ks[5], encoder_dim, encoder_dim)     # instance proj L1
    w2, b2 = lin(ks[6], ks[7], encoder_dim, feature_dim)     # instance proj L2
    w3, b3 = lin(ks[8], ks[9], encoder_dim, encoder_dim)     # cluster  proj L1
    w4, b4 = lin(ks[10], ks[11], encoder_dim, class_num)     # cluster  proj L2
    return dict(we=we, be=be, wd=wd, bd=bd, w1=w1, b1=b1, w2=w2, b2=b2,
                w3=w3, b3=b3, w4=w4, b4=b4)


def pack_params(params, patch_dim, encoder_dim, feature_dim, class_num):
    """Pad to 128-lane multiples, fuse the projector-head weights, and cast
    the big streaming GEMM weights (encoder/decoder) to bf16 for the MXU."""
    pd_pad = _round_up(patch_dim, 128)
    d_pad = _round_up(encoder_dim, 128)
    f_pad = _round_up(feature_dim, 128)
    c_pad = _round_up(class_num, 128)

    def pad_to(a, rows, cols):
        return jnp.pad(a, ((0, rows - a.shape[0]), (0, cols - a.shape[1])))

    we = pad_to(params["we"], pd_pad, d_pad).astype(jnp.bfloat16)
    be = pad_to(params["be"], 1, d_pad)                       # f32 (added post-acc)
    wd = pad_to(params["wd"], d_pad, pd_pad).astype(jnp.bfloat16)
    bd = pad_to(params["bd"], 1, pd_pad)                      # f32

    # fused first projector layer:  present @ [w1 | w3]   (f32, tiny, per-view)
    w13 = jnp.zeros((d_pad, 2 * d_pad), jnp.float32)
    w13 = w13.at[:encoder_dim, :encoder_dim].set(params["w1"])
    w13 = w13.at[:encoder_dim, d_pad:d_pad + encoder_dim].set(params["w3"])
    b13 = jnp.zeros((1, 2 * d_pad), jnp.float32)
    b13 = b13.at[:, :encoder_dim].set(params["b1"])
    b13 = b13.at[:, d_pad:d_pad + encoder_dim].set(params["b3"])

    # fused block-diagonal second layer: [h1 | h2] @ [[w2, 0], [0, w4]]
    wzc = jnp.zeros((2 * d_pad, f_pad + c_pad), jnp.float32)
    wzc = wzc.at[:encoder_dim, :feature_dim].set(params["w2"])
    wzc = wzc.at[d_pad:d_pad + encoder_dim,
                 f_pad:f_pad + class_num].set(params["w4"])
    bzc = jnp.zeros((1, f_pad + c_pad), jnp.float32)
    bzc = bzc.at[:, f_pad:].set(-1e30)          # padded class logits -> exp ~ 0
    bzc = bzc.at[:, :feature_dim].set(params["b2"])
    bzc = bzc.at[:, f_pad:f_pad + class_num].set(params["b4"])

    return dict(we=we, be=be, wd=wd, bd=bd, w13=w13, b13=b13, wzc=wzc, bzc=bzc)


# ----------------------------------------------------------------------------
# Pure-JAX reference (mirrors the PyTorch module with the same MAE stub)
# ----------------------------------------------------------------------------
def reference_forward(x_i, x_j, params, patch):
    hp = jax.lax.Precision.HIGHEST

    def mae(x):
        p = patchify(x, patch)
        B, P, pd = p.shape
        flat = p.reshape(B * P, pd)
        enc = jnp.maximum(jnp.dot(flat, params["we"], precision=hp) + params["be"], 0.0)
        present = enc.reshape(B, P, -1).mean(axis=1)
        rec = jnp.dot(enc, params["wd"], precision=hp) + params["bd"]
        return jnp.mean((rec - flat) ** 2), present

    def instance(p):
        h = jnp.maximum(jnp.dot(p, params["w1"], precision=hp) + params["b1"], 0.0)
        z = jnp.dot(h, params["w2"], precision=hp) + params["b2"]
        n = jnp.maximum(jnp.linalg.norm(z, axis=1, keepdims=True), 1e-12)
        return z / n

    def cluster(p):
        h = jnp.maximum(jnp.dot(p, params["w3"], precision=hp) + params["b3"], 0.0)
        logits = jnp.dot(h, params["w4"], precision=hp) + params["b4"]
        return jax.nn.softmax(logits, axis=1)

    l1, p1 = mae(x_i)
    l2, p2 = mae(x_j)
    return (instance(p1), instance(p2), cluster(p1), cluster(p2)), l1, l2


if __name__ == "__main__":
    B, C, H, W = 2, 3, 16, 16
    PATCH = 4
    ENCODER_DIM = 32     # mae.encoder_dim
    FEATURE_DIM = 16     # feature_dim
    CLASS_NUM = 8        # class_num
    PATCH_DIM = C * PATCH * PATCH

    key = jax.random.PRNGKey(0)
    k_xi, k_xj, k_p = jax.random.split(key, 3)
    x_i = jax.random.normal(k_xi, (B, C, H, W), jnp.float32)
    x_j = jax.random.normal(k_xj, (B, C, H, W), jnp.float32)

    params = init_params(k_p, PATCH_DIM, ENCODER_DIM, FEATURE_DIM, CLASS_NUM)
    packed = pack_params(params, PATCH_DIM, ENCODER_DIM, FEATURE_DIM, CLASS_NUM)
    cfg = (PATCH_DIM, ENCODER_DIM, FEATURE_DIM, CLASS_NUM)

    fwd = jax.jit(network_mae_forward, static_argnums=(3, 4))
    (z_i, z_j, c_i, c_j), loss_1, loss_2 = fwd(x_i, x_j, packed, cfg, PATCH)
    jax.block_until_ready((z_i, z_j, c_i, c_j, loss_1, loss_2))

    # shape / invariant checks
    assert z_i.shape == (B, FEATURE_DIM) and z_j.shape == (B, FEATURE_DIM)
    assert c_i.shape == (B, CLASS_NUM) and c_j.shape == (B, CLASS_NUM)
    assert jnp.allclose(jnp.sum(c_i, axis=1), 1.0, atol=1e-4)
    assert jnp.allclose(jnp.sum(c_j, axis=1), 1.0, atol=1e-4)
    assert jnp.allclose(jnp.linalg.norm(z_i, axis=1), 1.0, atol=1e-4)
    assert jnp.allclose(jnp.linalg.norm(z_j, axis=1), 1.0, atol=1e-4)

    # cross-check against the pure-JAX reference (tol covers bf16 MXU inputs)
    (rz_i, rz_j, rc_i, rc_j), rl1, rl2 = reference_forward(x_i, x_j, params, PATCH)
    for got, want in [(z_i, rz_i), (z_j, rz_j), (c_i, rc_i), (c_j, rc_j),
                      (loss_1, rl1), (loss_2, rl2)]:
        assert jnp.allclose(got, want, atol=1e-2, rtol=1e-2)

    print("KERNEL_OK")
</pallas_src>

<mosaic_0001>
module attributes {stable_mosaic.version = 11 : i64} {
  func.func @kernel(%arg0: i32, %arg1: i32, %arg2: memref<1x32x128xbf16, #tpu.memory_space<vmem>>, %arg3: memref<128x128xbf16, #tpu.memory_space<vmem>>, %arg4: memref<1x128xf32, #tpu.memory_space<vmem>>, %arg5: memref<128x128xbf16, #tpu.memory_space<vmem>>, %arg6: memref<1x128xf32, #tpu.memory_space<vmem>>, %arg7: memref<128x256xf32, #tpu.memory_space<vmem>>, %arg8: memref<1x256xf32, #tpu.memory_space<vmem>>, %arg9: memref<256x256xf32, #tpu.memory_space<vmem>>, %arg10: memref<1x256xf32, #tpu.memory_space<vmem>>, %arg11: memref<1x2x256xf32, #tpu.memory_space<vmem>>, %arg12: memref<1x1x128xf32, #tpu.memory_space<vmem>>, %arg13: memref<2x128xf32, #tpu.memory_space<vmem>>) attributes {dimension_semantics = [#tpu.dimension_semantics<parallel>, #tpu.dimension_semantics<arbitrary>], iteration_bounds = array<i64: 2, 1>, scalar_prefetch = 0 : i64, scratch_operands = 1 : i64, tpu.core_type = #tpu.core_type<tc>, window_params = [{transform_indices = @transform_0, window_bounds = array<i64: 1, 32, 128>}, {pipeline_mode = #tpu.pipeline_mode<synchronous>, transform_indices = @transform_1, window_bounds = array<i64: 128, 128>}, {pipeline_mode = #tpu.pipeline_mode<synchronous>, transform_indices = @transform_2, window_bounds = array<i64: 1, 128>}, {pipeline_mode = #tpu.pipeline_mode<synchronous>, transform_indices = @transform_3, window_bounds = array<i64: 128, 128>}, {pipeline_mode = #tpu.pipeline_mode<synchronous>, transform_indices = @transform_4, window_bounds = array<i64: 1, 128>}, {pipeline_mode = #tpu.pipeline_mode<synchronous>, transform_indices = @transform_5, window_bounds = array<i64: 128, 256>}, {pipeline_mode = #tpu.pipeline_mode<synchronous>, transform_indices = @transform_6, window_bounds = array<i64: 1, 256>}, {pipeline_mode = #tpu.pipeline_mode<synchronous>, transform_indices = @transform_7, window_bounds = array<i64: 256, 256>}, {pipeline_mode = #tpu.pipeline_mode<synchronous>, transform_indices = @transform_8, window_bounds = array<i64: 1, 256>}, {transform_indices = @transform_9, window_bounds = array<i64: 1, 2, 256>}, {transform_indices = @transform_10, window_bounds = array<i64: 1, 1, 128>}]} {
    %c0_i32 = arith.constant 0 : i32
    %0 = arith.cmpi eq, %arg1, %c0_i32 : i32
    %1 = arith.extui %0 : i1 to i32
    %c0_i32_0 = arith.constant 0 : i32
    %2 = arith.cmpi ne, %1, %c0_i32_0 : i32
    scf.if %2 {
      %cst_30 = arith.constant 0.000000e+00 : f32
      %52 = vector.broadcast %cst_30 : f32 to vector<2x128xf32>
      %c0_31 = arith.constant 0 : index
      %c0_32 = arith.constant 0 : index
      %53 = vector.load %arg13[%c0_31, %c0_32] : memref<2x128xf32, #tpu.memory_space<vmem>>, vector<2x128xf32>
      tpu.vector_store %arg13[%c0_31, %c0_32], %52 {strides = array<i32>} : memref<2x128xf32, #tpu.memory_space<vmem>>, vector<2x128xf32>,
      %cst_33 = arith.constant 0.000000e+00 : f32
      %54 = vector.broadcast %cst_33 : f32 to vector<1x1x128xf32>
      %c0_34 = arith.constant 0 : index
      %c0_35 = arith.constant 0 : index
      %c0_36 = arith.constant 0 : index
      %55 = vector.load %arg12[%c0_34, %c0_35, %c0_36] : memref<1x1x128xf32, #tpu.memory_space<vmem>>, vector<1x1x128xf32>
      tpu.vector_store %arg12[%c0_34, %c0_35, %c0_36], %54 {strides = array<i32>} : memref<1x1x128xf32, #tpu.memory_space<vmem>>, vector<1x1x128xf32>,
    } else {
    }
    %c0 = arith.constant 0 : index
    %c0_1 = arith.constant 0 : index
    %c0_2 = arith.constant 0 : index
    %3 = vector.load %arg2[%c0, %c0_1, %c0_2] : memref<1x32x128xbf16, #tpu.memory_space<vmem>>, vector<1x32x128xbf16>
    %4 = vector.shape_cast %3 : vector<1x32x128xbf16> to vector<32x128xbf16>
    %c0_3 = arith.constant 0 : index
    %c0_4 = arith.constant 0 : index
    %5 = vector.load %arg3[%c0_3, %c0_4] : memref<128x128xbf16, #tpu.memory_space<vmem>>, vector<128x128xbf16>
    %cst = arith.constant dense<0.000000e+00> : vector<32x128xf32>
    %6 = tpu.matmul %4, %5, %cst {dimension_numbers = #tpu.dot_dimension_numbers<[1], [0], [0], [1], [0, 0, 1, 1], [], []>} : vector<32x128xbf16>, vector<128x128xbf16>, vector<32x128xf32> -> vector<32x128xf32>
    %c0_5 = arith.constant 0 : index
    %c0_6 = arith.constant 0 : index
    %7 = vector.load %arg4[%c0_5, %c0_6] : memref<1x128xf32, #tpu.memory_space<vmem>>, vector<1x128xf32>
    %8 = vector.broadcast %7 : vector<1x128xf32> to vector<32x128xf32>
    %9 = arith.addf %6, %8 : vector<32x128xf32>
    %cst_7 = arith.constant 0.000000e+00 : f32
    %10 = vector.broadcast %cst_7 : f32 to vector<32x128xf32>
    %11 = arith.maximumf %9, %10 : vector<32x128xf32>
    %12 = tpu.iota {dimensions = array<i32: 1>} : vector<2x32xi32>
    %c32_i32 = arith.constant 32 : i32
    %13 = arith.muli %arg1, %c32_i32 : i32
    %14 = vector.broadcast %13 : i32 to vector<2x32xi32>
    %15 = arith.addi %12, %14 : vector<2x32xi32>
    %16 = tpu.iota {dimensions = array<i32: 0>} : vector<2x32xi32>
    %c16_i32 = arith.constant 16 : i32
    %17 = vector.broadcast %c16_i32 : i32 to vector<2x32xi32>
    %18 = arith.muli %16, %17 : vector<2x32xi32>
    %19 = arith.cmpi sge, %15, %18 : vector<2x32xi32>
    %c16_i32_8 = arith.constant 16 : i32
    %20 = vector.broadcast %c16_i32_8 : i32 to vector<2x32xi32>
    %21 = arith.addi %18, %20 : vector<2x32xi32>
    %22 = arith.cmpi slt, %15, %21 : vector<2x32xi32>
    %23 = arith.andi %19, %22 : vector<2x32xi1>
    %24 = arith.extui %23 : vector<2x32xi1> to vector<2x32xi32>
    %25 = arith.sitofp %24 : vector<2x32xi32> to vector<2x32xf32>
    %cst_9 = arith.constant 6.250000e-02 : f32
    %26 = vector.broadcast %cst_9 : f32 to vector<2x32xf32>
    %27 = arith.mulf %25, %26 : vector<2x32xf32>
    %c0_10 = arith.constant 0 : index
    %c0_11 = arith.constant 0 : index
    %28 = vector.load %arg13[%c0_10, %c0_11] : memref<2x128xf32, #tpu.memory_space<vmem>>, vector<2x128xf32>
    %cst_12 = arith.constant dense<0.000000e+00> : vector<2x128xf32>
    %29 = tpu.matmul %27, %11, %cst_12 {dimension_numbers = #tpu.dot_dimension_numbers<[1], [0], [0], [1], [0, 0, 1, 1], [], []>} : vector<2x32xf32>, vector<32x128xf32>, vector<2x128xf32> -> vector<2x128xf32>
    %30 = arith.addf %28, %29 : vector<2x128xf32>
    %c0_13 = arith.constant 0 : index
    %c0_14 = arith.constant 0 : index
    %31 = vector.load %arg13[%c0_13, %c0_14] : memref<2x128xf32, #tpu.memory_space<vmem>>, vector<2x128xf32>
    tpu.vector_store %arg13[%c0_13, %c0_14], %30 {strides = array<i32>} : memref<2x128xf32, #tpu.memory_space<vmem>>, vector<2x128xf32>,
    %32 = arith.truncf %11 : vector<32x128xf32> to vector<32x128xbf16>
    %c0_15 = arith.constant 0 : index
    %c0_16 = arith.constant 0 : index
    %33 = vector.load %arg5[%c0_15, %c0_16] : memref<128x128xbf16, #tpu.memory_space<vmem>>, vector<128x128xbf16>
    %cst_17 = arith.constant dense<0.000000e+00> : vector<32x128xf32>
    %34 = tpu.matmul %32, %33, %cst_17 {dimension_numbers = #tpu.dot_dimension_numbers<[1], [0], [0], [1], [0, 0, 1, 1], [], []>} : vector<32x128xbf16>, vector<128x128xbf16>, vector<32x128xf32> -> vector<32x128xf32>
    %c0_18 = arith.constant 0 : index
    %c0_19 = arith.constant 0 : index
    %35 = vector.load %arg6[%c0_18, %c0_19] : memref<1x128xf32, #tpu.memory_space<vmem>>, vector<1x128xf32>
    %36 = vector.broadcast %35 : vector<1x128xf32> to vector<32x128xf32>
    %37 = arith.addf %34, %36 : vector<32x128xf32>
    %38 = arith.extf %4 : vector<32x128xbf16> to vector<32x128xf32>
    %39 = arith.subf %37, %38 : vector<32x128xf32>
    %c0_20 = arith.constant 0 : index
    %c0_21 = arith.constant 0 : index
    %c0_22 = arith.constant 0 : index
    %40 = vector.load %arg12[%c0_20, %c0_21, %c0_22] : memref<1x1x128xf32, #tpu.memory_space<vmem>>, vector<1x1x128xf32>
    %41 = arith.mulf %39, %39 : vector<32x128xf32>
    %cst_23 = arith.constant dense<0.000000e+00> : vector<128xf32>
    %42 = vector.multi_reduction <add>, %41, %cst_23 [0] : vector<32x128xf32> to vector<128xf32>
    %43 = vector.shape_cast %42 : vector<128xf32> to vector<1x128xf32>
    %cst_24 = arith.constant 6.51041686E-4 : f32
    %44 = vector.broadcast %cst_24 : f32 to vector<1x128xf32>
    %45 = arith.mulf %44, %43 : vector<1x128xf32>
    %46 = vector.shape_cast %45 : vector<1x128xf32> to vector<1x1x128xf32>
    %47 = arith.addf %40, %46 : vector<1x1x128xf32>
    %c0_25 = arith.constant 0 : index
    %c0_26 = arith.constant 0 : index
    %c0_27 = arith.constant 0 : index
    %48 = vector.load %arg12[%c0_25, %c0_26, %c0_27] : memref<1x1x128xf32, #tpu.memory_space<vmem>>, vector<1x1x128xf32>
    tpu.vector_store %arg12[%c0_25, %c0_26, %c0_27], %47 {strides = array<i32>} : memref<1x1x128xf32, #tpu.memory_space<vmem>>, vector<1x1x128xf32>,
    %c0_i32_28 = arith.constant 0 : i32
    %49 = arith.cmpi eq, %arg1, %c0_i32_28 : i32
    %50 = arith.extui %49 : i1 to i32
    %c0_i32_29 = arith.constant 0 : i32
    %51 = arith.cmpi ne, %50, %c0_i32_29 : i32
    scf.if %51 {
      %c0_30 = arith.constant 0 : index
      %c0_31 = arith.constant 0 : index
      %52 = vector.load %arg13[%c0_30, %c0_31] : memref<2x128xf32, #tpu.memory_space<vmem>>, vector<2x128xf32>
      %c0_32 = arith.constant 0 : index
      %c0_33 = arith.constant 0 : index
      %53 = vector.load %arg7[%c0_32, %c0_33] : memref<128x256xf32, #tpu.memory_space<vmem>>, vector<128x256xf32>
      %cst_34 = arith.constant dense<0.000000e+00> : vector<2x256xf32>
      %54 = tpu.matmul %52, %53, %cst_34 {dimension_numbers = #tpu.dot_dimension_numbers<[1], [0], [0], [1], [0, 0, 1, 1], [], []>} : vector<2x128xf32>, vector<128x256xf32>, vector<2x256xf32> -> vector<2x256xf32>
      %c0_35 = arith.constant 0 : index
      %c0_36 = arith.constant 0 : index
      %55 = vector.load %arg8[%c0_35, %c0_36] : memref<1x256xf32, #tpu.memory_space<vmem>>, vector<1x256xf32>
      %56 = vector.broadcast %55 : vector<1x256xf32> to vector<2x256xf32>
      %57 = arith.addf %54, %56 : vector<2x256xf32>
      %cst_37 = arith.constant 0.000000e+00 : f32
      %58 = vector.broadcast %cst_37 : f32 to vector<2x256xf32>
      %59 = arith.maximumf %57, %58 : vector<2x256xf32>
      %c0_38 = arith.constant 0 : index
      %c0_39 = arith.constant 0 : index
      %60 = vector.load %arg9[%c0_38, %c0_39] : memref<256x256xf32, #tpu.memory_space<vmem>>, vector<256x256xf32>
      %cst_40 = arith.constant dense<0.000000e+00> : vector<2x256xf32>
      %61 = tpu.matmul %59, %60, %cst_40 {dimension_numbers = #tpu.dot_dimension_numbers<[1], [0], [0], [1], [0, 0, 1, 1], [], []>} : vector<2x256xf32>, vector<256x256xf32>, vector<2x256xf32> -> vector<2x256xf32>
      %c0_41 = arith.constant 0 : index
      %c0_42 = arith.constant 0 : index
      %62 = vector.load %arg10[%c0_41, %c0_42] : memref<1x256xf32, #tpu.memory_space<vmem>>, vector<1x256xf32>
      %63 = vector.broadcast %62 : vector<1x256xf32> to vector<2x256xf32>
      %64 = arith.addf %61, %63 : vector<2x256xf32>
      %65 = vector.extract_strided_slice %64 {offsets = [0, 0], sizes = [2, 128], strides = [1, 1]} : vector<2x256xf32> to vector<2x128xf32>
      %66 = vector.extract_strided_slice %64 {offsets = [0, 128], sizes = [2, 128], strides = [1, 1]} : vector<2x256xf32> to vector<2x128xf32>
      %67 = arith.mulf %65, %65 : vector<2x128xf32>
      %cst_43 = arith.constant dense<0.000000e+00> : vector<2xf32>
      %68 = vector.multi_reduction <add>, %67, %cst_43 [1] : vector<2x128xf32> to vector<2xf32>
      %69 = vector.shape_cast %68 : vector<2xf32> to vector<2x1xf32>
      %cst_44 = arith.constant 1.000000e-24 : f32
      %70 = vector.broadcast %cst_44 : f32 to vector<2x1xf32>
      %71 = arith.maximumf %69, %70 : vector<2x1xf32>
      %72 = math.rsqrt %71 : vector<2x1xf32>
      %73 = vector.broadcast %72 : vector<2x1xf32> to vector<2x128xf32>
      %74 = arith.mulf %65, %73 : vector<2x128xf32>
      %75 = vector.shape_cast %74 : vector<2x128xf32> to vector<1x2x128xf32>
      %c0_45 = arith.constant 0 : index
      %c0_46 = arith.constant 0 : index
      %c0_47 = arith.constant 0 : index
      %76 = vector.load %arg11[%c0_45, %c0_46, %c0_47] : memref<1x2x256xf32, #tpu.memory_space<vmem>>, vector<1x2x128xf32>
      tpu.vector_store %arg11[%c0_45, %c0_46, %c0_47], %75 {strides = array<i32>} : memref<1x2x256xf32, #tpu.memory_space<vmem>>, vector<1x2x128xf32>,
      %cst_48 = arith.constant dense<0xFF800000> : vector<2xf32>
      %77 = vector.multi_reduction <maximumf>, %66, %cst_48 [1] : vector<2x128xf32> to vector<2xf32>
      %78 = vector.shape_cast %77 : vector<2xf32> to vector<2x1xf32>
      %79 = vector.broadcast %78 : vector<2x1xf32> to vector<2x128xf32>
      %80 = arith.subf %66, %79 : vector<2x128xf32>
      %81 = math.exp %80 : vector<2x128xf32>
      %cst_49 = arith.constant dense<0.000000e+00> : vector<2xf32>
      %82 = vector.multi_reduction <add>, %81, %cst_49 [1] : vector<2x128xf32> to vector<2xf32>
      %83 = vector.shape_cast %82 : vector<2xf32> to vector<2x1xf32>
      %84 = tpu.reciprocal %83 : vector<2x1xf32> -> vector<2x1xf32>
      %85 = vector.broadcast %84 : vector<2x1xf32> to vector<2x128xf32>
      %86 = arith.mulf %81, %85 : vector<2x128xf32>
      %87 = vector.shape_cast %86 : vector<2x128xf32> to vector<1x2x128xf32>
      %c0_50 = arith.constant 0 : index
      %c0_51 = arith.constant 0 : index
      %c128 = arith.constant 128 : index
      %88 = vector.load %arg11[%c0_50, %c0_51, %c128] : memref<1x2x256xf32, #tpu.memory_space<vmem>>, vector<1x2x128xf32>
      tpu.vector_store %arg11[%c0_50, %c0_51, %c128], %87 {strides = array<i32>} : memref<1x2x256xf32, #tpu.memory_space<vmem>>, vector<1x2x128xf32>,
    } else {
    }
    return
  }
  func.func @transform_0(%arg0: i32, %arg1: i32) -> (i32, i32, i32) {
    %c0_i32 = arith.constant 0 : i32
    %c0_i32_0 = arith.constant 0 : i32
    return %arg0, %arg1, %c0_i32 : i32, i32, i32
  }
  func.func @transform_1(%arg0: i32, %arg1: i32) -> (i32, i32) {
    %c0_i32 = arith.constant 0 : i32
    %c0_i32_0 = arith.constant 0 : i32
    %c0_i32_1 = arith.constant 0 : i32
    return %c0_i32, %c0_i32_0 : i32, i32
  }
  func.func @transform_2(%arg0: i32, %arg1: i32) -> (i32, i32) {
    %c0_i32 = arith.constant 0 : i32
    %c0_i32_0 = arith.constant 0 : i32
    %c0_i32_1 = arith.constant 0 : i32
    return %c0_i32, %c0_i32_0 : i32, i32
  }
  func.func @transform_3(%arg0: i32, %arg1: i32) -> (i32, i32) {
    %c0_i32 = arith.constant 0 : i32
    %c0_i32_0 = arith.constant 0 : i32
    %c0_i32_1 = arith.constant 0 : i32
    return %c0_i32, %c0_i32_0 : i32, i32
  }
  func.func @transform_4(%arg0: i32, %arg1: i32) -> (i32, i32) {
    %c0_i32 = arith.constant 0 : i32
    %c0_i32_0 = arith.constant 0 : i32
    %c0_i32_1 = arith.constant 0 : i32
    return %c0_i32, %c0_i32_0 : i32, i32
  }
  func.func @transform_5(%arg0: i32, %arg1: i32) -> (i32, i32) {
    %c0_i32 = arith.constant 0 : i32
    %c0_i32_0 = arith.constant 0 : i32
    %c0_i32_1 = arith.constant 0 : i32
    return %c0_i32, %c0_i32_0 : i32, i32
  }
  func.func @transform_6(%arg0: i32, %arg1: i32) -> (i32, i32) {
    %c0_i32 = arith.constant 0 : i32
    %c0_i32_0 = arith.constant 0 : i32
    %c0_i32_1 = arith.constant 0 : i32
    return %c0_i32, %c0_i32_0 : i32, i32
  }
  func.func @transform_7(%arg0: i32, %arg1: i32) -> (i32, i32) {
    %c0_i32 = arith.constant 0 : i32
    %c0_i32_0 = arith.constant 0 : i32
    %c0_i32_1 = arith.constant 0 : i32
    return %c0_i32, %c0_i32_0 : i32, i32
  }
  func.func @transform_8(%arg0: i32, %arg1: i32) -> (i32, i32) {
    %c0_i32 = arith.constant 0 : i32
    %c0_i32_0 = arith.constant 0 : i32
    %c0_i32_1 = arith.constant 0 : i32
    return %c0_i32, %c0_i32_0 : i32, i32
  }
  func.func @transform_9(%arg0: i32, %arg1: i32) -> (i32, i32, i32) {
    %c0_i32 = arith.constant 0 : i32
    %c0_i32_0 = arith.constant 0 : i32
    %c0_i32_1 = arith.constant 0 : i32
    return %arg0, %c0_i32, %c0_i32_0 : i32, i32, i32
  }
  func.func @transform_10(%arg0: i32, %arg1: i32) -> (i32, i32, i32) {
    %c0_i32 = arith.constant 0 : i32
    %c0_i32_0 = arith.constant 0 : i32
    %c0_i32_1 = arith.constant 0 : i32
    return %arg0, %c0_i32, %c0_i32_0 : i32, i32, i32
  }
}

</mosaic_0001>

<bundles_post_ra>
// kernel: network_mae_forward.1
= control target key start
LH: loop header
LB: loop body
LE: loop exit
PB: predicated region body
PF: predicated region fallthrough
CT: control target
= control target key end

     0   :  { %s1410_s13 = smov 0   ;;  %s1412_s14 = smov 0   ;;  %s1835_s0 = inlined_call_operand.vmem [shape: bf16[2,32,128], index: 0, kind: input, shape index: {}]   ;;  %s1836_s1 = inlined_call_operand.vmem [shape: bf16[128,128], index: 1, kind: input, shape index: {}]   ;;  %s1837_s2 = inlined_call_operand.vmem [shape: f32[1,128], index: 2, kind: input, shape index: {}]   ;;  %s1838_s3 = inlined_call_operand.vmem [shape: bf16[128,128], index: 3, kind: input, shape index: {}]   ;;  %s1839_s4 = inlined_call_operand.vmem [shape: f32[1,128], index: 4, kind: input, shape index: {}]   ;;  %s1840_s5 = inlined_call_operand.vmem [shape: f32[128,256], index: 5, kind: input, shape index: {}]   ;;  %s1841_s6 = inlined_call_operand.vmem [shape: f32[1,256], index: 6, kind: input, shape index: {}]   ;;  %s1842_s7 = inlined_call_operand.vmem [shape: f32[256,256], index: 7, kind: input, shape index: {}]   ;;  %s1843_s8 = inlined_call_operand.vmem [shape: f32[1,256], index: 8, kind: input, shape index: {}]   ;;  %s1844_s9 = inlined_call_operand.vmem [shape: f32[2,2,256], index: 9, kind: output, shape index: {0}]   ;;  %s1845_s10 = inlined_call_operand.vmem [shape: f32[2,1,128], index: 10, kind: output, shape index: {1}]  }
   0x1   :  { %s1414_s15 = smov 0  }
   0x2 LB: > { %s33_s16 = sadd.s32 1, %s1347_s14  ;;  %p1170_p0 = scmp.ge.s32.totalorder %s1351_s15, 1  ;;  %s1351_s15 = sphi %s1414_s15, %s21_s15   ;;  %s1347_s14 = sphi %s1412_s14, %s1847_s14   ;;  %s1343_s13 = sphi %s1410_s13, %s1846_s13  }
   0x3   : > { %p35_p1 = scmp.ge.s32.totalorder %s33_s16, 2  ;;  %p334_p2 = scmp.lt.s32.totalorder %s1351_s15, 3 }
   0x5   : > { %s1849_s16 = smov (%p35_p1, %s33_s16), 0  ;;  %p335_p3 = pnand %p1170_p0, %p334_p2 }
   0x6   : > { %p380_p4 = scmp.lt.s32.totalorder (!%p335_p3), %s1343_s13, 1 }
   0x7   : > { %338 = sbr.rel (%p335_p3) target bundleno = 1166 (0x48e), region = 56 }
   0xc   : > { %v1303_v0 = vld [vmem:[%s1836_s1 + $0x38] sm:$0xff]   ;;  %v1304_v1 = vld [vmem:[%s1836_s1 + $0x30] sm:$0xff]   ;;  %s1851_s13 = smov (!%p380_p4, %s1343_s13), 1  ;;  %v1353_v2 = vmov 0.0   ;;  %v1305_v3 = vld [vmem:[%s1836_s1 + $0x28] sm:$0xff]   ;;  %vm1354_vm0 = vmmov 0   ;;  %v544_v19 = vlaneseq }
   0xd   : > { %1226 = vmatprep.subr.bf16.mxu0 %v1303_v0  ;;  %402 = vst [vmem:[#allocation2] sm:$0x3] %v1353_v2  ;;  %s1199_s23 = sshll.u32 %s1851_s13, 4  ;;  %s1445_s26 = scalar_lea.vmem %s1845_s10, %s1851_s13  ;;  %v1306_v4 = vld [vmem:[%s1836_s1 + $0x20] sm:$0xff]   ;;  %v1313_v6 = vld [vmem:[%s1838_s3 + $0x38] sm:$0xff]   ;;  %v1314_v7 = vld [vmem:[%s1838_s3 + $0x30] sm:$0xff]  }
   0xe   : > { %1227 = vmatpush3.bf16.msra.mxu0 %v1303_v0  ;;  %s1450_s29 = scalar_lea.vmem %s1835_s0, %s1199_s23  ;;  %403 = vst [vmem:[%s1445_s26] sm:$0x1] %v1353_v2  ;;  %v1307_v8 = vld [vmem:[%s1836_s1 + $0x18] sm:$0xff]   ;;  %1257 = vmatprep.subr.bf16.mxu1 %v1313_v6  ;;  %v1315_v9 = vld [vmem:[%s1838_s3 + $0x28] sm:$0xff]   ;;  %v1308_v10 = vld [vmem:[%s1836_s1 + $0x10] sm:$0xff]   ;;  %v1503_v20 = vshrl.u32 %v544_v19, 7  ;;  %v545_v22 = vand.u32 127, %v544_v19 }
   0xf   : > { %1228 = vmatprep.subr.bf16.mxu0 %v1304_v1  ;;  %v1458_v5 = vld [vmem:[%s1450_s29] sm:$0xff]   ;;  %1258 = vmatpush3.bf16.msra.mxu1 %v1313_v6  ;;  %v1309_v12 = vld [vmem:[%s1836_s1 + $0x8] sm:$0xff]   ;;  %v1317_v13 = vld [vmem:[%s1838_s3 + $0x18] sm:$0xff]   ;;  %vm560_vm4 = vcmask 261120   ;;  %vm1052_vm5 = vcmask 1041408   ;;  %s1200_s11 = sshll.u32 %s1851_s13, 2 }
  0x10   : > { %1242 = vmatprep.mubr.bf16.mxu0 %v1458_v5  ;;  %1259 = vmatprep.subr.bf16.mxu1 %v1314_v7  ;;  %v1316_v11 = vld [vmem:[%s1838_s3 + $0x20] sm:$0xff]   ;;  %v1489_v15 = vld [vmem:[%s1450_s29 + $0x8] sm:$0xff]   ;;  %v1318_v16 = vld [vmem:[%s1838_s3 + $0x10] sm:$0xff]   ;;  %v551_v21 = vmul.u32 16, %v1503_v20  ;;  %s393_s18 = scalar_lea.vmem %s1844_s9, %s1200_s11 }
  0x11   : > { %v1310_v14 = vld [vmem:[%s1836_s1] sm:$0xff]   ;;  %v1319_v17 = vld [vmem:[%s1838_s3 + $0x8] sm:$0xff]   ;;  %v818_v41 = vld [vmem:[%s1840_s5 + $0xf8] sm:$0xff] }
  0x12   : > { %1229 = vmatpush3.bf16.msra.mxu0 %v1304_v1  ;;  %v1320_v18 = vld [vmem:[%s1838_s3] sm:$0xff]   ;;  %v553_v23 = vadd.s32 16, %v551_v21  ;;  %vm552_vm1 = vcmp.ge.s32.totalorder %v545_v22, %v551_v21  ;;  %v817_v42 = vld [vmem:[%s1840_s5 + $0xf0] sm:$0xff]  ;;  %v816_v43 = vld [vmem:[%s1840_s5 + $0xe8] sm:$0xff] }
  0x13   : > { %1230 = vmatprep.subr.bf16.mxu0 %v1305_v3  ;;  %1260 = vmatpush3.bf16.msra.mxu1 %v1314_v7  ;;  %v1175_v25 = vld [vmem:[%s1837_s2] ss:$0 sm:$0xff]  ;;  %v814_v45 = vld [vmem:[%s1840_s5 + $0xd8] sm:$0xff]  ;;  %v813_v46 = vld [vmem:[%s1840_s5 + $0xd0] sm:$0xff] }
  0x14   : > { %1261 = vmatprep.subr.bf16.mxu1 %v1315_v9  ;;  %vm554_vm2 = vcmp.lt.s32.totalorder %v545_v22, %v553_v23  ;;  %v815_v44 = vld [vmem:[%s1840_s5 + $0xe0] sm:$0xff]  ;;  %v812_v47 = vld [vmem:[%s1840_s5 + $0xc8] sm:$0xff]  ;;  %v810_v49 = vld [vmem:[%s1840_s5 + $0xb8] sm:$0xff] }
  0x15   : > { %vm555_vm3 = vmand %vm552_vm1, %vm554_vm2  ;;  %v811_v48 = vld [vmem:[%s1840_s5 + $0xc0] sm:$0xff]  ;;  %v809_v50 = vld [vmem:[%s1840_s5 + $0xb0] sm:$0xff] }
  0x16   : > { %1231 = vmatpush3.bf16.msra.mxu0 %v1305_v3  ;;  %v1186_v37 = vsel %vm555_vm3, 1.0, %v1353_v2  ;;  %v808_v51 = vld [vmem:[%s1840_s5 + $0xa8] sm:$0xff]  ;;  %v807_v52 = vld [vmem:[%s1840_s5 + $0xa0] sm:$0xff]  ;;  %v806_v53 = vld [vmem:[%s1840_s5 + $0x98] sm:$0xff] }
  0x17   : > { %1232 = vmatprep.subr.bf16.mxu0 %v1306_v4  ;;  %1262 = vmatpush3.bf16.msra.mxu1 %v1315_v9  ;;  %v558_v40 = vmul.f32 0.0625, %v1186_v37  ;;  %v805_v54 = vld [vmem:[%s1840_s5 + $0x90] sm:$0xff]  ;;  %v804_v55 = vld [vmem:[%s1840_s5 + $0x88] sm:$0xff]  ;;  %v803_v56 = vld [vmem:[%s1840_s5 + $0x80] sm:$0xff] }
  0x18   : > { %1263 = vmatprep.subr.bf16.mxu1 %v1316_v11  ;;  %v802_v57 = vld [vmem:[%s1840_s5 + $0x78] sm:$0xff]  ;;  %v801_v58 = vld [vmem:[%s1840_s5 + $0x70] sm:$0xff]  ;;  %v800_v59 = vld [vmem:[%s1840_s5 + $0x68] sm:$0xff] }
  0x19   : > { %v799_v60 = vld [vmem:[%s1840_s5 + $0x60] sm:$0xff]  ;;  %v798_v61 = vld [vmem:[%s1840_s5 + $0x58] sm:$0xff]  ;;  %v797_v62 = vld [vmem:[%s1840_s5 + $0x50] sm:$0xff] }
  0x1a   : > { %1233 = vmatpush3.bf16.msra.mxu0 %v1306_v4  ;;  %v796_v63 = vld [vmem:[%s1840_s5 + $0x48] sm:$0xff]  ;;  %v795_v0 = vld [vmem:[%s1840_s5 + $0x40] sm:$0xff]  ;;  %v794_v1 = vld [vmem:[%s1840_s5 + $0x38] sm:$0xff] }
  0x1b   : > { %1234 = vmatprep.subr.bf16.mxu0 %v1307_v8  ;;  %1264 = vmatpush3.bf16.msra.mxu1 %v1316_v11  ;;  %v792_v3 = vld [vmem:[%s1840_s5 + $0x28] sm:$0xff]  ;;  %v791_v4 = vld [vmem:[%s1840_s5 + $0x20] sm:$0xff]  ;;  %v790_v6 = vld [vmem:[%s1840_s5 + $0x18] sm:$0xff] }
  0x1c   : > { %1265 = vmatprep.subr.bf16.mxu1 %v1317_v13  ;;  %v789_v7 = vld [vmem:[%s1840_s5 + $0x10] sm:$0xff]  ;;  %v787_v9 = vld [vmem:[%s1840_s5] sm:$0xff]  ;;  %v927_v19 = vld [vmem:[%s1842_s7 + $0xb8] sm:$0xff] }
  0x1d   : > { %v934_v11 = vld [vmem:[%s1842_s7 + $0xf0] sm:$0xff]  ;;  %v925_v22 = vld [vmem:[%s1842_s7 + $0xa8] sm:$0xff]  ;;  %v924_v23 = vld [vmem:[%s1842_s7 + $0xa0] sm:$0xff] }
  0x1e   : > { %1235 = vmatpush3.bf16.msra.mxu0 %v1307_v8  ;;  %v788_v8 = vld [vmem:[%s1840_s5 + $0x8] sm:$0xff]  ;;  %v926_v21 = vld [vmem:[%s1842_s7 + $0xb0] sm:$0xff] }
  0x1f   : > { %1236 = vmatprep.subr.bf16.mxu0 %v1308_v10  ;;  %1266 = vmatpush3.bf16.msra.mxu1 %v1317_v13  ;;  %v932_v13 = vld [vmem:[%s1842_s7 + $0xe0] sm:$0xff]  ;;  %v910_v37 = vld [vmem:[%s1842_s7 + $0x30] sm:$0xff] }
  0x20   : > { %1267 = vmatprep.subr.bf16.mxu1 %v1318_v16 }
  0x22   : > { %1237 = vmatpush3.bf16.msra.mxu0 %v1308_v10  ;;  %v935_v10 = vld [vmem:[%s1842_s7 + $0xf8] sm:$0xff] }
  0x23   : > { %1238 = vmatprep.subr.bf16.mxu0 %v1309_v12  ;;  %1268 = vmatpush3.bf16.msra.mxu1 %v1318_v16  ;;  %v930_v16 = vld [vmem:[%s1842_s7 + $0xd0] sm:$0xff] }
  0x24   : > { %1269 = vmatprep.subr.bf16.mxu1 %v1319_v17 }
  0x26   : > { %1239 = vmatpush3.bf16.msra.mxu0 %v1309_v12  ;;  %v933_v12 = vld [vmem:[%s1842_s7 + $0xe8] sm:$0xff] }
  0x27   : > { %1240 = vmatprep.subr.bf16.mxu0 %v1310_v14  ;;  %1270 = vmatpush3.bf16.msra.mxu1 %v1319_v17  ;;  %v929_v17 = vld [vmem:[%s1842_s7 + $0xc8] sm:$0xff] }
  0x28   : > { %1271 = vmatprep.subr.bf16.mxu1 %v1320_v18 }
  0x2a   : > { %1241 = vmatpush3.bf16.msra.mxu0 %v1310_v14  ;;  %v931_v14 = vld [vmem:[%s1842_s7 + $0xd8] sm:$0xff] }
  0x2b   : > { %1246 = vmatprep.subr.mxu0 %v1353_v2  ;;  %1272 = vmatpush3.bf16.msra.mxu1 %v1320_v18  ;;  %v928_v18 = vld [vmem:[%s1842_s7 + $0xc0] sm:$0xff] }
  0x2c   : > { %980 = vmatprep.subr.mxu1 %v935_v10  ;;  %v758_v10 = vunpack.c.l.bf16 %v1458_v5 }
  0x2d   : > { %1243 = vmatmul.mubr.bf16.vlgmr.msra.gmra.mxu0 %v1489_v15 }
  0x2e   : > { %1254 = vmatprep.mubr.msk.f32.mxu0 %vm1354_vm0, %v1353_v2 }
  0xed   : > { %v1244_v24 = vpop.f32.mrf.mxu0 }
  0xee   : > { %v534_v28 = vadd.f32 %v1244_v24, %v1175_v25  ;;  %v923_v24 = vld [vmem:[%s1842_s7 + $0x98] sm:$0xff] }
  0xef   : > { %v525_v26 = vpop.f32.mrf.mxu0 }
  0xf0   : > { %v526_v29 = vadd.f32 %v1175_v25, %v525_v26  ;;  %v542_v34 = vmax.f32 %v534_v28, 0.0  ;;  %v921_v26 = vld [vmem:[%s1842_s7 + $0x88] sm:$0xff]  ;;  %v919_v28 = vld [vmem:[%s1842_s7 + $0x78] sm:$0xff] }
  0xf1   : > { %v1245_v27 = vpop.f32.mrf.mxu0 }
  0xf2   : > { %v537_v30 = vadd.f32 %v1245_v27, %v1175_v25  ;;  %v540_v35 = vmax.f32 %v526_v29, 0.0  ;;  %v920_v27 = vld [vmem:[%s1842_s7 + $0x80] sm:$0xff]  ;;  %v918_v29 = vld [vmem:[%s1842_s7 + $0x70] sm:$0xff] }
  0xf3   : > { %v528_v31 = vpop.f32.mrf.mxu0 }
  0xf4   : > { %v543_v32 = vmax.f32 %v537_v30, 0.0  ;;  %v529_v33 = vadd.f32 %v1175_v25, %v528_v31  ;;  %v922_v25 = vld [vmem:[%s1842_s7 + $0x90] sm:$0xff]  ;;  %v917_v30 = vld [vmem:[%s1842_s7 + $0x68] sm:$0xff]  ;;  %v916_v31 = vld [vmem:[%s1842_s7 + $0x60] sm:$0xff] }
  0xf6   : > { %v541_v36 = vmax.f32 %v529_v33, 0.0  ;;  %1247 = vmatpush3.msra.mxu0 %v543_v32  ;;  %v637_v39 = vpack.c.bf16 %v543_v32, %v542_v34  ;;  %v915_v32 = vld [vmem:[%s1842_s7 + $0x58] sm:$0xff]  ;;  %v914_v33 = vld [vmem:[%s1842_s7 + $0x50] sm:$0xff] }
  0xf7   : > { %1248 = vmatprep.subr.mxu0 %v1353_v2 }
  0xf8   : > { %1249 = vmatpush3.msra.mxu0 %v542_v34  ;;  %v636_v38 = vpack.c.bf16 %v541_v36, %v540_v35  ;;  %v913_v34 = vld [vmem:[%s1842_s7 + $0x48] sm:$0xff] }
  0xf9   : > { %1250 = vmatprep.subr.mxu0 %v1353_v2 }
  0xfa   : > { %1251 = vmatpush3.msra.mxu0 %v541_v36  ;;  %1273 = vmatprep.mubr.bf16.mxu1 %v636_v38  ;;  %v911_v36 = vld [vmem:[%s1842_s7 + $0x38] sm:$0xff]  ;;  %v909_v38 = vld [vmem:[%s1842_s7 + $0x28] sm:$0xff] }
  0xfb   : > { %1252 = vmatprep.subr.mxu0 %v1353_v2  ;;  %1274 = vmatmul.mubr.bf16.vlgmr.msra.gmra.mxu1 %v637_v39  ;;  %v908_v39 = vld [vmem:[%s1842_s7 + $0x20] sm:$0xff] }
  0xfc   : > { %1253 = vmatpush3.msra.mxu0 %v540_v35  ;;  %981 = vmatpush1.msra.mxu1 %v934_v11  ;;  %v912_v35 = vld [vmem:[%s1842_s7 + $0x40] sm:$0xff] }
  0xfd   : > { %1255 = vmatmul.mubr.msk.f32.vlgmr.msra.gmra.mxu0 %vm560_vm4, %v558_v40  ;;  %831 = vmatprep.subr.mxu0 %v818_v41  ;;  %v907_v40 = vld [vmem:[%s1842_s7 + $0x18] sm:$0xff]  ;;  %v906_v41 = vld [vmem:[%s1842_s7 + $0x10] sm:$0xff] }
  0xfe   : > { %832 = vmatpush1.msra.mxu0 %v817_v42  ;;  %895 = vmatprep.mubr.f32.mxu0 %v1353_v2  ;;  %v793_v2 = vld [vmem:[%s1840_s5 + $0x30] sm:$0xff]  ;;  %v905_v42 = vld [vmem:[%s1842_s7 + $0x8] sm:$0xff] }
  0xff   : > { %833 = vmatprep.subr.mxu0 %v816_v43  ;;  %982 = vmatprep.subr.mxu1 %v933_v12  ;;  %v904_v43 = vld [vmem:[%s1842_s7] sm:$0xff] }
 0x100   : > { %834 = vmatpush1.msra.mxu0 %v815_v44  ;;  %983 = vmatpush1.msra.mxu1 %v932_v13  ;;  %v967_v44 = vld [vmem:[%s1842_s7 + $0x1f8] sm:$0xff] }
 0x101   : > { %835 = vmatprep.subr.mxu0 %v814_v45  ;;  %984 = vmatprep.subr.mxu1 %v931_v14  ;;  %v966_v45 = vld [vmem:[%s1842_s7 + $0x1f0] sm:$0xff] }
 0x102   : > { %836 = vmatpush1.msra.mxu0 %v813_v46  ;;  %985 = vmatpush1.msra.mxu1 %v930_v16  ;;  %v965_v46 = vld [vmem:[%s1842_s7 + $0x1e8] sm:$0xff]  ;;  %v759_v16 = vunpack.c.h.bf16 %v1458_v5 }
 0x103   : > { %837 = vmatprep.subr.mxu0 %v812_v47  ;;  %986 = vmatprep.subr.mxu1 %v929_v17  ;;  %v964_v47 = vld [vmem:[%s1842_s7 + $0x1e0] sm:$0xff] }
 0x104   : > { %838 = vmatpush1.msra.mxu0 %v811_v48  ;;  %987 = vmatpush1.msra.mxu1 %v928_v18  ;;  %v963_v48 = vld [vmem:[%s1842_s7 + $0x1d8] sm:$0xff]  ;;  %v760_v18 = vunpack.c.l.bf16 %v1489_v15 }
 0x105   : > { %839 = vmatprep.subr.mxu0 %v810_v49  ;;  %988 = vmatprep.subr.mxu1 %v927_v19  ;;  %v962_v49 = vld [vmem:[%s1842_s7 + $0x1d0] sm:$0xff] }
 0x106   : > { %840 = vmatpush1.msra.mxu0 %v809_v50  ;;  %989 = vmatpush1.msra.mxu1 %v926_v21  ;;  %v961_v50 = vld [vmem:[%s1842_s7 + $0x1c8] sm:$0xff] }
 0x107   : > { %841 = vmatprep.subr.mxu0 %v808_v51  ;;  %990 = vmatprep.subr.mxu1 %v925_v22  ;;  %v960_v51 = vld [vmem:[%s1842_s7 + $0x1c0] sm:$0xff] }
 0x108   : > { %842 = vmatpush1.msra.mxu0 %v807_v52  ;;  %991 = vmatpush1.msra.mxu1 %v924_v23  ;;  %v959_v52 = vld [vmem:[%s1842_s7 + $0x1b8] sm:$0xff]  ;;  %v761_v23 = vunpack.c.h.bf16 %v1489_v15 }
 0x109   : > { %843 = vmatprep.subr.mxu0 %v806_v53  ;;  %992 = vmatprep.subr.mxu1 %v923_v24  ;;  %v958_v53 = vld [vmem:[%s1842_s7 + $0x1b0] sm:$0xff] }
 0x10a   : > { %844 = vmatpush1.msra.mxu0 %v805_v54  ;;  %993 = vmatpush1.msra.mxu1 %v922_v25  ;;  %v957_v54 = vld [vmem:[%s1842_s7 + $0x1a8] sm:$0xff] }
 0x10b   : > { %845 = vmatprep.subr.mxu0 %v804_v55  ;;  %994 = vmatprep.subr.mxu1 %v921_v26  ;;  %v956_v55 = vld [vmem:[%s1842_s7 + $0x1a0] sm:$0xff] }
 0x10c   : > { %846 = vmatpush1.msra.mxu0 %v803_v56  ;;  %995 = vmatpush1.msra.mxu1 %v920_v27  ;;  %v955_v56 = vld [vmem:[%s1842_s7 + $0x198] sm:$0xff] }
 0x10d   : > { %847 = vmatprep.subr.mxu0 %v802_v57  ;;  %996 = vmatprep.subr.mxu1 %v919_v28  ;;  %v954_v57 = vld [vmem:[%s1842_s7 + $0x190] sm:$0xff] }
 0x10e   : > { %848 = vmatpush1.msra.mxu0 %v801_v58  ;;  %997 = vmatpush1.msra.mxu1 %v918_v29  ;;  %v953_v58 = vld [vmem:[%s1842_s7 + $0x188] sm:$0xff] }
 0x10f   : > { %849 = vmatprep.subr.mxu0 %v800_v59  ;;  %998 = vmatprep.subr.mxu1 %v917_v30  ;;  %v952_v59 = vld [vmem:[%s1842_s7 + $0x180] sm:$0xff] }
 0x110   : > { %850 = vmatpush1.msra.mxu0 %v799_v60  ;;  %999 = vmatpush1.msra.mxu1 %v916_v31  ;;  %v951_v60 = vld [vmem:[%s1842_s7 + $0x178] sm:$0xff] }
 0x111   : > { %851 = vmatprep.subr.mxu0 %v798_v61  ;;  %1000 = vmatprep.subr.mxu1 %v915_v32  ;;  %v950_v61 = vld [vmem:[%s1842_s7 + $0x170] sm:$0xff] }
 0x112   : > { %852 = vmatpush1.msra.mxu0 %v797_v62  ;;  %1001 = vmatpush1.msra.mxu1 %v914_v33  ;;  %v949_v62 = vld [vmem:[%s1842_s7 + $0x168] sm:$0xff] }
 0x113   : > { %853 = vmatprep.subr.mxu0 %v796_v63  ;;  %1002 = vmatprep.subr.mxu1 %v913_v34  ;;  %v948_v63 = vld [vmem:[%s1842_s7 + $0x160] sm:$0xff] }
 0x114   : > { %854 = vmatpush1.msra.mxu0 %v795_v0  ;;  %1003 = vmatpush1.msra.mxu1 %v912_v35  ;;  %v947_v0 = vld [vmem:[%s1842_s7 + $0x158] sm:$0xff] }
 0x115   : > { %855 = vmatprep.subr.mxu0 %v794_v1  ;;  %1004 = vmatprep.subr.mxu1 %v911_v36  ;;  %v946_v1 = vld [vmem:[%s1842_s7 + $0x150] sm:$0xff] }
 0x116   : > { %856 = vmatpush1.msra.mxu0 %v793_v2  ;;  %1005 = vmatpush1.msra.mxu1 %v910_v37  ;;  %v945_v2 = vld [vmem:[%s1842_s7 + $0x148] sm:$0xff] }
 0x117   : > { %857 = vmatprep.subr.mxu0 %v792_v3  ;;  %1006 = vmatprep.subr.mxu1 %v909_v38  ;;  %v944_v3 = vld [vmem:[%s1842_s7 + $0x140] sm:$0xff] }
 0x118   : > { %858 = vmatpush1.msra.mxu0 %v791_v4  ;;  %1007 = vmatpush1.msra.mxu1 %v908_v39 }
 0x119   : > { %859 = vmatprep.subr.mxu0 %v790_v6  ;;  %1008 = vmatprep.subr.mxu1 %v907_v40  ;;  %v559_v6 = vld [vmem:[#allocation2] sm:$0x3] }
 0x11a   : > { %860 = vmatpush1.msra.mxu0 %v789_v7  ;;  %1009 = vmatpush1.msra.mxu1 %v906_v41  ;;  %v1188_v7 = vld [vmem:[%s1839_s4] ss:$0 sm:$0xff] }
 0x11b   : > { %861 = vmatprep.subr.mxu0 %v788_v8  ;;  %1010 = vmatprep.subr.mxu1 %v905_v42  ;;  %v766_v40 = vld [vmem:[%s1445_s26] sm:$0x1] }
 0x11c   : > { %862 = vmatpush1.msra.mxu0 %v787_v9  ;;  %1011 = vmatpush1.msra.mxu1 %v904_v43  ;;  %v943_v43 = vld [vmem:[%s1842_s7 + $0x138] sm:$0xff] }
 0x11d   : > { %1012 = vmatprep.subr.mxu1 %v967_v44  ;;  %v942_v44 = vld [vmem:[%s1842_s7 + $0x130] sm:$0xff] }
 0x11e   : > { %1013 = vmatpush2.msra.mxu1 %v966_v45  ;;  %v941_v45 = vld [vmem:[%s1842_s7 + $0x128] sm:$0xff] }
 0x11f   : > { %1014 = vmatprep.subr.mxu1 %v965_v46  ;;  %v940_v46 = vld [vmem:[%s1842_s7 + $0x120] sm:$0xff] }
 0x120   : > { %1015 = vmatpush2.msra.mxu1 %v964_v47  ;;  %v939_v47 = vld [vmem:[%s1842_s7 + $0x118] sm:$0xff] }
 0x121   : > { %1016 = vmatprep.subr.mxu1 %v963_v48  ;;  %v938_v48 = vld [vmem:[%s1842_s7 + $0x110] sm:$0xff] }
 0x122   : > { %1017 = vmatpush2.msra.mxu1 %v962_v49  ;;  %v937_v49 = vld [vmem:[%s1842_s7 + $0x108] sm:$0xff] }
 0x123   : > { %1018 = vmatprep.subr.mxu1 %v961_v50  ;;  %v936_v50 = vld [vmem:[%s1842_s7 + $0x100] sm:$0xff] }
 0x124   : > { %1019 = vmatpush2.msra.mxu1 %v960_v51  ;;  %v823_v51 = vsub.s32 0, %v1503_v20 }
 0x125   : > { %1020 = vmatprep.subr.mxu1 %v959_v52  ;;  %v819_v52 = vld [vmem:[%s1841_s6] sm:$0x3] }
 0x126   : > { %1021 = vmatpush2.msra.mxu1 %v958_v53  ;;  %v827_v53 = vsub.s32 1, %v1503_v20 }
 0x127   : > { %1022 = vmatprep.subr.mxu1 %v957_v54  ;;  %v824_v54 = vrot.slane %v819_v52, %v823_v51 }
 0x128   : > { %1023 = vmatpush2.msra.mxu1 %v956_v55  ;;  %v828_v55 = vrot.slane %v819_v52, %v827_v53 }
 0x129   : > { %1024 = vmatprep.subr.mxu1 %v955_v56 }
 0x12a   : > { %1025 = vmatpush2.msra.mxu1 %v954_v57 }
 0x12b   : > { %1026 = vmatprep.subr.mxu1 %v953_v58 }
 0x12c   : > { %1027 = vmatpush2.msra.mxu1 %v952_v59 }
 0x12d   : > { %1028 = vmatprep.subr.mxu1 %v951_v60 }
 0x12e   : > { %1029 = vmatpush2.msra.mxu1 %v950_v61 }
 0x12f   : > { %1030 = vmatprep.subr.mxu1 %v949_v62  ;;  %v968_v62 = vld [vmem:[%s1843_s8] sm:$0x3] }
 0x130   : > { %1031 = vmatpush2.msra.mxu1 %v948_v63  ;;  %v973_v63 = vrot.slane %v968_v62, %v823_v51 }
 0x131   : > { %1032 = vmatprep.subr.mxu1 %v947_v0  ;;  %v977_v0 = vrot.slane %v968_v62, %v827_v53 }
 0x132   : > { %1033 = vmatpush2.msra.mxu1 %v946_v1 }
 0x133   : > { %1034 = vmatprep.subr.mxu1 %v945_v2 }
 0x134   : > { %1035 = vmatpush2.msra.mxu1 %v944_v3 }
 0x135   : > { %1036 = vmatprep.subr.mxu1 %v943_v43 }
 0x136   : > { %1037 = vmatpush2.msra.mxu1 %v942_v44 }
 0x137   : > { %1038 = vmatprep.subr.mxu1 %v941_v45 }
 0x138   : > { %1039 = vmatpush2.msra.mxu1 %v940_v46 }
 0x139   : > { %1040 = vmatprep.subr.mxu1 %v939_v47 }
 0x13a   : > { %1041 = vmatpush2.msra.mxu1 %v938_v48 }
 0x13b   : > { %1042 = vmatprep.subr.mxu1 %v937_v49 }
 0x13c   : > { %1043 = vmatpush2.msra.mxu1 %v936_v50 }
 0x1bb   : > { %v1275_v4 = vpop.f32.mrf.mxu1 }
 0x1bc   : > { %v752_v17 = vadd.f32 %v1275_v4, %v1188_v7 }
 0x1bd   : > { %v630_v8 = vpop.f32.mrf.mxu0  ;;  %v743_v9 = vpop.f32.mrf.mxu1 }
 0x1be   : > { %v634_v11 = vadd.f32 %v630_v8, %v559_v6  ;;  %v744_v12 = vadd.f32 %v1188_v7, %v743_v9  ;;  %v764_v25 = vsub.f32 %v752_v17, %v760_v18 }
 0x1bf   : > { %v1256_v13 = vpop.f32.mrf.mxu0  ;;  %v1276_v14 = vpop.f32.mrf.mxu1 }
 0x1c0   : > { %635 = vst [vmem:[#allocation2] sm:$0x3] %v634_v11  ;;  %v762_v21 = vsub.f32 %v744_v12, %v758_v10  ;;  %v755_v22 = vadd.f32 %v1276_v14, %v1188_v7  ;;  %v769_v31 = vmul.f32 %v764_v25, %v764_v25 }
 0x1c1   : > { %v746_v19 = vpop.f32.mrf.mxu1 }
 0x1c2   : > { %v747_v24 = vadd.f32 %v1188_v7, %v746_v19  ;;  %v767_v27 = vmul.f32 %v762_v21, %v762_v21  ;;  %v765_v28 = vsub.f32 %v755_v22, %v761_v23 }
 0x1c4   : > { %v763_v26 = vsub.f32 %v747_v24, %v759_v16  ;;  %v770_v32 = vmul.f32 %v765_v28, %v765_v28 }
 0x1c6   : > { %v768_v29 = vmul.f32 %v763_v26, %v763_v26 }
 0x1c7   : > { %v786_v30 = vld [vmem:[#allocation2] sm:$0x3] }
 0x1c8   : > { %v771_v5 = vadd.f32 %v768_v29, %v767_v27  ;;  %896 = vmatmul.mubr.f32.vlgmr.msra.gmra.mxu0 %v786_v30 }
 0x1ca   : > { %v772_v33 = vadd.f32 %v771_v5, %v769_v31 }
 0x1cc   : > { %v773_v34 = vadd.f32 %v772_v33, %v770_v32 }
 0x1ce   : > { %v774_v35 = vrot.slane %v773_v34, 4 }
 0x1d0   : > { %v775_v36 = vadd.f32 %v774_v35, %v773_v34 }
 0x1d2   : > { %v776_v37 = vrot.slane %v775_v36, 2 }
 0x1d4   : > { %v777_v38 = vadd.f32 %v776_v37, %v775_v36 }
 0x1d6   : > { %v778_v15 = vrot.slane %v777_v38, 1 }
 0x1d8   : > { %v779_v39 = vadd.f32 %v778_v15, %v777_v38 }
 0x1da   : > { %v780_v41 = vmul.f32 0.0006510417, %v779_v39 }
 0x1dc   : > { %v781_v42 = vadd.f32 %v780_v41, %v766_v40 }
 0x1de   : > { %782 = vst [vmem:[%s1445_s26] sm:$0x1] %v781_v42 }
 0x288   : > { %v897_v56 = vpop.f32.mrf.mxu0 }
 0x289   : > { %v898_v57 = vadd.f32 %v897_v56, %v824_v54 }
 0x28a   : > { %v899_v58 = vpop.f32.mrf.mxu0 }
 0x28b   : > { %v900_v59 = vadd.f32 %v899_v58, %v828_v55  ;;  %v902_v61 = vmax.f32 %v898_v57, 0.0 }
 0x28d   : > { %v903_v60 = vmax.f32 %v900_v59, 0.0 }
 0x28f   : > { %1044 = vmatprep.mubr.f32.mxu1 %v903_v60 }
 0x290   : > { %1045 = vmatmul.mubr.f32.vlgmr.msra.gmra.mxu1 %v902_v61 }
 0x350   : > { %v1046_v1 = vpop.f32.mrf.mxu1 }
 0x351   : > { %v1047_v2 = vadd.f32 %v1046_v1, %v973_v63 }
 0x352   : > { %v1048_v20 = vpop.f32.mrf.mxu1 }
 0x353   : > { %v1049_v3 = vadd.f32 %v1048_v20, %v977_v0  ;;  %v1051_v6 = vmul.f32 %v1047_v2, %v1047_v2 }
 0x355   : > { %v1060_v4 = vsel %vm1052_vm5, %v1049_v3, -inf  ;;  %v1053_v7 = vsel %vm1052_vm5, %v1051_v6, 0.0 }
 0x356   : > { %1061 = vmax.xlane.f32.xlu0 %v1060_v4 }
 0x35a   : > { %1054 = vadd.xlane.f32.xlu0 %v1053_v7 }
 0x3df   : > { %v1062_v8 = vpop.xlane.xlu0 %1061 }
 0x3e0   : > { %v1063_v9 = vsub.f32 %v1049_v3, %v1062_v8 }
 0x3e2   : > { %v1064_v10 = vmul.f32 1.442695, %v1063_v9 }
 0x3e3   : > { %v1055_v11 = vpop.xlane.xlu0 %1054 }
 0x3e4   : > { %1323 = vpow2.f32 %v1064_v10  ;;  %v1056_v12 = vmax.f32 %v1055_v11, 1e-24 }
 0x3e6   : > { %1325 = vrsqrt.f32 %v1056_v12 }
 0x3f1   : > { %v1324_v13 = vpop.eup %1323 }
 0x3f2   : > { %v1066_v14 = vsel %vm1052_vm5, %v1324_v13, 0.0 }
 0x3f3   : > { %v1326_v16 = vpop.eup %1325  ;;  %1067 = vadd.xlane.f32.xlu1 %v1066_v14 }
 0x3f4   : > { %v1058_v17 = vmul.f32 %v1326_v16, %v1047_v2 }
 0x3f6   : > { %1059 = vst [vmem:[%s393_s18] sm:$0x3] %v1058_v17 }
 0x47c   : > { %v1068_v18 = vpop.xlane.xlu1 %1067 }
 0x47d   : > { %1327 = vrcp.f32 %v1068_v18 }
 0x48a   : > { %v1328_v19 = vpop.eup %1327 }
 0x48b   : > { %v1070_v21 = vmul.f32 %v1328_v19, %v1324_v13 }
 0x48d   : > { %1071 = vst [vmem:[%s393_s18 + $0x2] sm:$0x3] %v1070_v21 }
 0x48e PF: > { %s21_s15 = sadd.s32 1, %s1351_s15   ;;  %s1846_s13 = smov %s1347_s14 }
 0x48f   : > { %p18_p5 = scmp.ge.s32.totalorder %s21_s15, 4   ;;  %s1847_s14 = smov %s1849_s16 }
 0x491   :  { %20 = sbr.rel (!%p18_p5) target bundleno = 2 (0x2), region = 106 }

</bundles_post_ra>
